<compile_context>
chip_gen: v6e
topology: v6e:2x2x1
jax: 0.10.0
libtpu: 0.0.40
codegen_flags: <defaults>
</compile_context>

<pallas_src>
import math

import jax
import jax.numpy as jnp
import numpy as np
from jax.experimental import pallas as pl
from jax.experimental.pallas import tpu as pltpu


def _round_up(v, m):
    return ((v + m - 1) // m) * m


# --------------------------------------------------------------------------------------
# Kernel 1 (per graph b): h = relu(adj @ x @ W1 + b1); score = adj @ (h @ W2) + b2
# --------------------------------------------------------------------------------------
def _gcn_score_kernel(adj_ref, x_ref, w1_ref, b1_ref, w2_ref, b2_ref,
                      h_ref, score_ref):
    adj = adj_ref[0]                                                   # (NP, NP)
    xw = jnp.dot(x_ref[0], w1_ref[...],
                 preferred_element_type=jnp.float32)                   # (NP, Dout)
    h = jnp.dot(adj, xw, preferred_element_type=jnp.float32) + b1_ref[...]
    h = jnp.maximum(h, 0.0)                                            # ReLU, f32 VPU
    h_ref[0] = h.astype(h_ref.dtype)

    # Reassociated score GraphConv(Dout -> 1): (N,N)@(N,1) instead of (N,N)@(N,Dout).
    sc = jnp.dot(h, w2_ref[...], preferred_element_type=jnp.float32)   # (NP, 1)
    score = jnp.dot(adj, sc, preferred_element_type=jnp.float32) + b2_ref[...]
    score_ref[0] = score.astype(score_ref.dtype)


def gcn_relu_score(adj_blk, x_blk, w1, b1, w2_col, b2):
    b_total, np_pad, d_in = x_blk.shape
    d_out = w1.shape[1]
    return pl.pallas_call(
        _gcn_score_kernel,
        out_shape=(jax.ShapeDtypeStruct((b_total, np_pad, d_out), jnp.float32),
                   jax.ShapeDtypeStruct((b_total, np_pad, 1), jnp.float32)),
        grid=(b_total,),
        in_specs=[
            pl.BlockSpec((1, np_pad, np_pad), lambda b: (b, 0, 0)),   # adj block of graph b
            pl.BlockSpec((1, np_pad, d_in), lambda b: (b, 0, 0)),     # node feats of graph b
            pl.BlockSpec((d_in, d_out), lambda b: (0, 0)),            # W1 (shared)
            pl.BlockSpec((1, d_out), lambda b: (0, 0)),               # b1
            pl.BlockSpec((d_out, 1), lambda b: (0, 0)),               # W2 (column)
            pl.BlockSpec((1, 1), lambda b: (0, 0)),                   # b2
        ],
        out_specs=(pl.BlockSpec((1, np_pad, d_out), lambda b: (b, 0, 0)),
                   pl.BlockSpec((1, np_pad, 1), lambda b: (b, 0, 0))),
        compiler_params=pltpu.CompilerParams(
            dimension_semantics=("parallel",)),                        # megacore on v7x
    )(adj_blk, x_blk, w1, b1, w2_col, b2)


# --------------------------------------------------------------------------------------
# Kernel 2 (per graph b): pooled = feat * tanh(score); mean / max readout over valid rows
# --------------------------------------------------------------------------------------
def _sagpool_readout_kernel(feat_ref, score_ref, mask_ref, cnt_ref,
                            pooled_ref, mean_ref, max_ref):
    feat = feat_ref[0]                                     # (KP, D)
    mask = mask_ref[0]                                     # (KP, 1) 0/1 valid-row mask
    pooled = feat * jnp.tanh(score_ref[0])                 # tanh -> EUP slot
    pooled_ref[0] = pooled.astype(pooled_ref.dtype)

    # mean over valid rows: masked sum * approx-reciprocal of the count (EUP slot).
    num = jnp.sum(pooled * mask, axis=0, keepdims=True)    # (1, D)
    inv = pl.reciprocal(cnt_ref[0], approx=True)           # (1, 1)
    mean_ref[0] = (num * inv).astype(mean_ref.dtype)

    # max over valid rows: single vectorized masked reduce (finite sentinel, not -inf).
    neg = jnp.float32(-3.4e38)
    masked = jnp.where(mask > 0.5, pooled, neg)
    max_ref[0] = jnp.max(masked, axis=0, keepdims=True).astype(max_ref.dtype)


def sagpool_readout(feat_sel, score_sel, mask_col, cnt):
    b_total, kp, d = feat_sel.shape
    return pl.pallas_call(
        _sagpool_readout_kernel,
        out_shape=(jax.ShapeDtypeStruct((b_total, kp, d), jnp.float32),
                   jax.ShapeDtypeStruct((b_total, 1, d), jnp.float32),
                   jax.ShapeDtypeStruct((b_total, 1, d), jnp.float32)),
        grid=(b_total,),
        in_specs=[
            pl.BlockSpec((1, kp, d), lambda b: (b, 0, 0)),
            pl.BlockSpec((1, kp, 1), lambda b: (b, 0, 0)),
            pl.BlockSpec((1, kp, 1), lambda b: (b, 0, 0)),
            pl.BlockSpec((1, 1, 1), lambda b: (b, 0, 0)),
        ],
        out_specs=(pl.BlockSpec((1, kp, d), lambda b: (b, 0, 0)),
                   pl.BlockSpec((1, 1, d), lambda b: (b, 0, 0)),
                   pl.BlockSpec((1, 1, d), lambda b: (b, 0, 0))),
        compiler_params=pltpu.CompilerParams(
            dimension_semantics=("parallel",)),
    )(feat_sel, score_sel, mask_col, cnt)


# --------------------------------------------------------------------------------------
# ConvPoolBlock forward (glue around the two kernels)
# --------------------------------------------------------------------------------------
def conv_pool_block_forward(adj_norm, x, w1, b1, w2_col, b2, batch_num_nodes, ratio):
    """Returns (perm, next_batch_num_nodes, pooled_feature, g_out, conv_out, score)."""
    b_total = len(batch_num_nodes)
    np_pad = _round_up(max(batch_num_nodes), 8)

    # Split the block-diagonal adjacency / features into padded per-graph blocks.
    adj_blocks, x_blocks = [], []
    start = 0
    for n in batch_num_nodes:
        a = adj_norm[start:start + n, start:start + n]
        adj_blocks.append(jnp.pad(a, ((0, np_pad - n), (0, np_pad - n))))
        x_blocks.append(jnp.pad(x[start:start + n], ((0, np_pad - n), (0, 0))))
        start += n
    adj_blk = jnp.stack(adj_blocks)                         # (B, NP, NP)
    x_blk = jnp.stack(x_blocks)                             # (B, NP, Din)

    h_pad, score_pad = gcn_relu_score(adj_blk, x_blk, w1, b1, w2_col, b2)

    conv_out = jnp.concatenate([h_pad[b, :n] for b, n in enumerate(batch_num_nodes)], axis=0)
    score = jnp.concatenate([score_pad[b, :n, 0] for b, n in enumerate(batch_num_nodes)], axis=0)

    # ---- SAGPool top-k per graph (glue: argsort + gather) ----
    ks = [max(1, int(math.ceil(ratio * n))) for n in batch_num_nodes]
    kp = _round_up(max(ks), 8)

    perm_parts, feat_parts, ssel_parts = [], [], []
    mask_np = np.zeros((b_total, kp, 1), np.float32)
    start = 0
    for b, (n, k) in enumerate(zip(batch_num_nodes, ks)):
        order = jnp.argsort(-score_pad[b, :n, 0])[:k]       # descending top-k (local idx)
        perm_parts.append(start + order)
        feat_parts.append(jnp.pad(h_pad[b][order], ((0, kp - k), (0, 0))))
        ssel_parts.append(jnp.pad(score_pad[b][order], ((0, kp - k), (0, 0))))
        mask_np[b, :k, 0] = 1.0
        start += n
    perm = jnp.concatenate(perm_parts)
    feat_sel = jnp.stack(feat_parts)                        # (B, KP, D)
    score_sel = jnp.stack(ssel_parts)                       # (B, KP, 1)
    mask_col = jnp.asarray(mask_np)                         # (B, KP, 1)
    cnt = jnp.asarray(np.array(ks, np.float32).reshape(b_total, 1, 1))

    pooled_pad, mean_g, max_g = sagpool_readout(feat_sel, score_sel, mask_col, cnt)
    pooled_feat = jnp.concatenate([pooled_pad[b, :k] for b, k in enumerate(ks)], axis=0)
    g_out = jnp.concatenate([mean_g[:, 0, :], max_g[:, 0, :]], axis=-1)   # (B, 2D)

    # TODO(synk): dgl.node_subgraph edge re-extraction has no dense-Pallas equivalent here;
    # the pooled "graph" is represented by (perm, next_batch_num_nodes) metadata only.
    return perm, ks, pooled_feat, g_out, conv_out, score


# --------------------------------------------------------------------------------------
# main
# --------------------------------------------------------------------------------------
if __name__ == "__main__":
    in_dim, out_dim = 16, 32
    pool_ratio = 0.8
    batch_num_nodes = [10, 6]                               # 2 graphs batched, N = 16
    n_nodes = sum(batch_num_nodes)

    # Block-diagonal symmetric ring adjacency with self-loops, then sym-normalize.
    adj_np = np.zeros((n_nodes, n_nodes), np.float32)
    start = 0
    for n in batch_num_nodes:
        for i in range(n):
            j = (i + 1) % n
            adj_np[start + i, start + j] = 1.0
            adj_np[start + j, start + i] = 1.0
            adj_np[start + i, start + i] = 1.0
        start += n
    deg = adj_np.sum(axis=1)
    dinv = 1.0 / np.sqrt(deg)
    adj_norm = jnp.asarray(adj_np * dinv[:, None] * dinv[None, :])

    key = jax.random.PRNGKey(0)
    k1, k2, k3 = jax.random.split(key, 3)
    x = jax.random.normal(k1, (n_nodes, in_dim), jnp.float32)
    # GraphConv(in_dim, out_dim): weight (in_dim, out_dim), bias zeros.
    w1 = jax.random.normal(k2, (in_dim, out_dim), jnp.float32) / math.sqrt(in_dim)
    b1 = jnp.zeros((1, out_dim), jnp.float32)
    # Score GraphConv(out_dim, 1): stored as a column vector (out_dim, 1).
    w2 = jax.random.normal(k3, (out_dim, 1), jnp.float32) / math.sqrt(out_dim)
    b2 = jnp.zeros((1, 1), jnp.float32)

    perm, next_bnn, pooled_feat, g_out, conv_out, score = conv_pool_block_forward(
        adj_norm, x, w1, b1, w2, b2, batch_num_nodes, pool_ratio)
    jax.block_until_ready((pooled_feat, g_out, conv_out, score))

    # ---- pure-numpy reference of the same math ----
    adj_r = np.asarray(adj_norm, np.float64)
    x_r = np.asarray(x, np.float64)
    w1_r, b1_r = np.asarray(w1, np.float64), np.asarray(b1, np.float64)
    w2_r, b2_r = np.asarray(w2, np.float64), np.asarray(b2, np.float64)
    h_r = np.maximum(adj_r @ x_r @ w1_r + b1_r, 0.0)
    s_r = ((adj_r @ h_r) @ w2_r)[:, 0] + b2_r[0, 0]         # original (un-reassociated) form
    perm_np = np.asarray(perm)
    pooled_r = h_r[perm_np] * np.tanh(s_r[perm_np])[:, None]
    seg_out = []
    off = 0
    for kk in next_bnn:
        seg = pooled_r[off:off + kk]
        seg_out.append(np.concatenate([seg.mean(0), seg.max(0)], axis=-1))
        off += kk
    gout_r = np.stack(seg_out, axis=0)

    np.testing.assert_allclose(np.asarray(conv_out), h_r, rtol=2e-3, atol=2e-3)
    np.testing.assert_allclose(np.asarray(score), s_r, rtol=2e-3, atol=2e-3)
    np.testing.assert_allclose(np.asarray(pooled_feat), pooled_r, rtol=2e-3, atol=2e-3)
    np.testing.assert_allclose(np.asarray(g_out), gout_r, rtol=2e-3, atol=2e-3)

    print("KERNEL_OK")
</pallas_src>

<mosaic_0001>
module attributes {stable_mosaic.version = 11 : i64} {
  func.func @_gcn_score_kernel(%arg0: i32, %arg1: memref<1x16x16xf32, #tpu.memory_space<vmem>>, %arg2: memref<1x16x16xf32, #tpu.memory_space<vmem>>, %arg3: memref<16x32xf32, #tpu.memory_space<vmem>>, %arg4: memref<1x32xf32, #tpu.memory_space<vmem>>, %arg5: memref<32x1xf32, #tpu.memory_space<vmem>>, %arg6: memref<1x1xf32, #tpu.memory_space<vmem>>, %arg7: memref<1x16x32xf32, #tpu.memory_space<vmem>>, %arg8: memref<1x16x1xf32, #tpu.memory_space<vmem>>) attributes {dimension_semantics = [#tpu.dimension_semantics<parallel>], iteration_bounds = array<i64: 2>, scalar_prefetch = 0 : i64, scratch_operands = 0 : i64, tpu.core_type = #tpu.core_type<tc>, window_params = [{transform_indices = @transform_0, window_bounds = array<i64: 1, 16, 16>}, {transform_indices = @transform_1, window_bounds = array<i64: 1, 16, 16>}, {pipeline_mode = #tpu.pipeline_mode<synchronous>, transform_indices = @transform_2, window_bounds = array<i64: 16, 32>}, {pipeline_mode = #tpu.pipeline_mode<synchronous>, transform_indices = @transform_3, window_bounds = array<i64: 1, 32>}, {pipeline_mode = #tpu.pipeline_mode<synchronous>, transform_indices = @transform_4, window_bounds = array<i64: 32, 1>}, {pipeline_mode = #tpu.pipeline_mode<synchronous>, transform_indices = @transform_5, window_bounds = array<i64: 1, 1>}, {transform_indices = @transform_6, window_bounds = array<i64: 1, 16, 32>}, {transform_indices = @transform_7, window_bounds = array<i64: 1, 16, 1>}]} {
    %c0 = arith.constant 0 : index
    %c0_0 = arith.constant 0 : index
    %c0_1 = arith.constant 0 : index
    %0 = vector.load %arg1[%c0, %c0_0, %c0_1] : memref<1x16x16xf32, #tpu.memory_space<vmem>>, vector<1x16x16xf32>
    %1 = vector.shape_cast %0 : vector<1x16x16xf32> to vector<16x16xf32>
    %c0_2 = arith.constant 0 : index
    %c0_3 = arith.constant 0 : index
    %c0_4 = arith.constant 0 : index
    %2 = vector.load %arg2[%c0_2, %c0_3, %c0_4] : memref<1x16x16xf32, #tpu.memory_space<vmem>>, vector<1x16x16xf32>
    %3 = vector.shape_cast %2 : vector<1x16x16xf32> to vector<16x16xf32>
    %c0_5 = arith.constant 0 : index
    %c0_6 = arith.constant 0 : index
    %4 = vector.load %arg3[%c0_5, %c0_6] : memref<16x32xf32, #tpu.memory_space<vmem>>, vector<16x32xf32>
    %cst = arith.constant dense<0.000000e+00> : vector<16x32xf32>
    %5 = tpu.matmul %3, %4, %cst {dimension_numbers = #tpu.dot_dimension_numbers<[1], [0], [0], [1], [0, 0, 1, 1], [], []>} : vector<16x16xf32>, vector<16x32xf32>, vector<16x32xf32> -> vector<16x32xf32>
    %cst_7 = arith.constant dense<0.000000e+00> : vector<16x32xf32>
    %6 = tpu.matmul %1, %5, %cst_7 {dimension_numbers = #tpu.dot_dimension_numbers<[1], [0], [0], [1], [0, 0, 1, 1], [], []>} : vector<16x16xf32>, vector<16x32xf32>, vector<16x32xf32> -> vector<16x32xf32>
    %c0_8 = arith.constant 0 : index
    %c0_9 = arith.constant 0 : index
    %7 = vector.load %arg4[%c0_8, %c0_9] : memref<1x32xf32, #tpu.memory_space<vmem>>, vector<1x32xf32>
    %8 = vector.broadcast %7 : vector<1x32xf32> to vector<16x32xf32>
    %9 = arith.addf %6, %8 : vector<16x32xf32>
    %cst_10 = arith.constant 0.000000e+00 : f32
    %10 = vector.broadcast %cst_10 : f32 to vector<16x32xf32>
    %11 = arith.maximumf %9, %10 : vector<16x32xf32>
    %c0_11 = arith.constant 0 : index
    %c0_12 = arith.constant 0 : index
    %c0_13 = arith.constant 0 : index
    %12 = vector.load %arg7[%c0_11, %c0_12, %c0_13] : memref<1x16x32xf32, #tpu.memory_space<vmem>>, vector<1x16x32xf32>
    %13 = vector.shape_cast %12 : vector<1x16x32xf32> to vector<16x32xf32>
    %14 = vector.shape_cast %11 : vector<16x32xf32> to vector<1x16x32xf32>
    tpu.vector_store %arg7[%c0_11, %c0_12, %c0_13], %14 {strides = array<i32>} : memref<1x16x32xf32, #tpu.memory_space<vmem>>, vector<1x16x32xf32>,
    %c0_14 = arith.constant 0 : index
    %c0_15 = arith.constant 0 : index
    %15 = vector.load %arg5[%c0_14, %c0_15] : memref<32x1xf32, #tpu.memory_space<vmem>>, vector<32x1xf32>
    %cst_16 = arith.constant dense<0.000000e+00> : vector<16x1xf32>
    %16 = tpu.matmul %11, %15, %cst_16 {dimension_numbers = #tpu.dot_dimension_numbers<[1], [0], [0], [1], [0, 0, 1, 1], [], []>} : vector<16x32xf32>, vector<32x1xf32>, vector<16x1xf32> -> vector<16x1xf32>
    %cst_17 = arith.constant dense<0.000000e+00> : vector<16x1xf32>
    %17 = tpu.matmul %1, %16, %cst_17 {dimension_numbers = #tpu.dot_dimension_numbers<[1], [0], [0], [1], [0, 0, 1, 1], [], []>} : vector<16x16xf32>, vector<16x1xf32>, vector<16x1xf32> -> vector<16x1xf32>
    %c0_18 = arith.constant 0 : index
    %c0_19 = arith.constant 0 : index
    %18 = vector.load %arg6[%c0_18, %c0_19] : memref<1x1xf32, #tpu.memory_space<vmem>>, vector<1x1xf32>
    %19 = vector.broadcast %18 : vector<1x1xf32> to vector<16x1xf32>
    %20 = arith.addf %17, %19 : vector<16x1xf32>
    %c0_20 = arith.constant 0 : index
    %c0_21 = arith.constant 0 : index
    %c0_22 = arith.constant 0 : index
    %21 = vector.load %arg8[%c0_20, %c0_21, %c0_22] : memref<1x16x1xf32, #tpu.memory_space<vmem>>, vector<1x16x1xf32>
    %22 = vector.shape_cast %21 : vector<1x16x1xf32> to vector<16x1xf32>
    %23 = vector.shape_cast %20 : vector<16x1xf32> to vector<1x16x1xf32>
    tpu.vector_store %arg8[%c0_20, %c0_21, %c0_22], %23 {strides = array<i32>} : memref<1x16x1xf32, #tpu.memory_space<vmem>>, vector<1x16x1xf32>,
    return
  }
  func.func @transform_0(%arg0: i32) -> (i32, i32, i32) {
    %c0_i32 = arith.constant 0 : i32
    %c0_i32_0 = arith.constant 0 : i32
    %c0_i32_1 = arith.constant 0 : i32
    return %arg0, %c0_i32, %c0_i32_0 : i32, i32, i32
  }
  func.func @transform_1(%arg0: i32) -> (i32, i32, i32) {
    %c0_i32 = arith.constant 0 : i32
    %c0_i32_0 = arith.constant 0 : i32
    %c0_i32_1 = arith.constant 0 : i32
    return %arg0, %c0_i32, %c0_i32_0 : i32, i32, i32
  }
  func.func @transform_2(%arg0: i32) -> (i32, i32) {
    %c0_i32 = arith.constant 0 : i32
    %c0_i32_0 = arith.constant 0 : i32
    %c0_i32_1 = arith.constant 0 : i32
    return %c0_i32, %c0_i32_0 : i32, i32
  }
  func.func @transform_3(%arg0: i32) -> (i32, i32) {
    %c0_i32 = arith.constant 0 : i32
    %c0_i32_0 = arith.constant 0 : i32
    %c0_i32_1 = arith.constant 0 : i32
    return %c0_i32, %c0_i32_0 : i32, i32
  }
  func.func @transform_4(%arg0: i32) -> (i32, i32) {
    %c0_i32 = arith.constant 0 : i32
    %c0_i32_0 = arith.constant 0 : i32
    %c0_i32_1 = arith.constant 0 : i32
    return %c0_i32, %c0_i32_0 : i32, i32
  }
  func.func @transform_5(%arg0: i32) -> (i32, i32) {
    %c0_i32 = arith.constant 0 : i32
    %c0_i32_0 = arith.constant 0 : i32
    %c0_i32_1 = arith.constant 0 : i32
    return %c0_i32, %c0_i32_0 : i32, i32
  }
  func.func @transform_6(%arg0: i32) -> (i32, i32, i32) {
    %c0_i32 = arith.constant 0 : i32
    %c0_i32_0 = arith.constant 0 : i32
    %c0_i32_1 = arith.constant 0 : i32
    return %arg0, %c0_i32, %c0_i32_0 : i32, i32, i32
  }
  func.func @transform_7(%arg0: i32) -> (i32, i32, i32) {
    %c0_i32 = arith.constant 0 : i32
    %c0_i32_0 = arith.constant 0 : i32
    %c0_i32_1 = arith.constant 0 : i32
    return %arg0, %c0_i32, %c0_i32_0 : i32, i32, i32
  }
}

</mosaic_0001>

<bundles_post_ra>
// kernel: tpu_custom_call.1
= control target key start
LH: loop header
LB: loop body
LE: loop exit
PB: predicated region body
PF: predicated region fallthrough
CT: control target
= control target key end

     0   :  { %s1382_s0 = inlined_call_operand.vmem [shape: f32[2,16,16], index: 0, kind: input, shape index: {}]   ;;  %s1383_s1 = inlined_call_operand.hbm [shape: f32[2,16,16], index: 1, kind: input, shape index: {}]   ;;  %s1384_s2 = inlined_call_operand.hbm [shape: f32[16,32], index: 2, kind: input, shape index: {}]   ;;  %s1385_s3 = inlined_call_operand.vmem [shape: f32[1,32], index: 3, kind: input, shape index: {}]   ;;  %s1386_s4 = inlined_call_operand.vmem [shape: f32[32,1], index: 4, kind: input, shape index: {}]   ;;  %s1387_s5 = inlined_call_operand.<no memory space> [shape: f32[1,1], index: 5, kind: input, shape index: {}]   ;;  %s1388_s6 = inlined_call_operand.hbm [shape: f32[2,16,32], index: 6, kind: output, shape index: {0}]   ;;  %s1389_s7 = inlined_call_operand.vmem [shape: f32[2,16,1], index: 7, kind: output, shape index: {1}]  }
   0x1   :  { %v13_v0 = vstv %s1387_s5 }
   0x2   :  { %14 = vst [vmem:[#allocation2] sm:$0x1] %v13_v0 }
   0x3   :  { %15 = vsyncpa [#allocation4], 0 }
   0x4   :  { %17 = vsyncpa [#allocation4 + $0x1], 0 }
   0x5   :  { %18 = vsyncpa [#allocation7], 0 }
   0x6   :  { %19 = vsyncpa [#allocation5], 0 }
   0x7   :  { %21 = vsyncpa [#allocation5 + $0x1], 0  ;;  %s1159_s26 = smov 0   ;;  %s1161_s27 = smov 0  }
   0x8   :  { %s1163_s28 = smov 0   ;;  %s1165_s29 = smov 0  }
   0x9 LB: > { %s1180_s5 = sadd.s32 4294967295, %s1107_s29   ;;  %s840_s30 = sadd.s32 4294967294, %s1107_s29   ;;  %s1107_s29 = sphi %s1165_s29, %s1415_s29   ;;  %s1103_s28 = sphi %s1163_s28, %s1414_s28   ;;  %s1099_s27 = sphi %s1161_s27, %s1413_s27   ;;  %s1095_s26 = sphi %s1159_s26, %s1412_s26  }
   0xa   : > { %p73_p0 = scmp.ne.s32.totalorder %s1099_s27, %s1095_s26  ;;  %p1390_p1 = scmp.eq.s32.totalorder %s1180_s5, 0 }
   0xb   : > { %p187_p3 = scmp.eq.s32.totalorder %s840_s30, 1  ;;  %p841_p5 = scmp.ge.s32.totalorder %s1107_s29, 1 }
   0xc   : > { %p1189_p4 = por %p1390_p1, %p73_p0  ;;  %p220_p7 = scmp.lt.s32.totalorder %s1107_s29, 3 }
   0xd   : > { %p1194_p6 = por %p187_p3, %p73_p0  ;;  %s1109_s11 = smov [#allocation6]  }
   0xe   : > { %s1396_s8 = scalar_select %p1189_p4, 1, 0 }
   0xf   : > { %s1397_s9 = scalar_select %p1194_p6, 1, 0 }
  0x10   : > { %p1199_p8 = pnand %p841_p5, %p220_p7  ;;  %s232_s12 = sshll.u32 %s1109_s11, 4  ;;  %s233_s12 = int_to_ptr.vmem [resolvable:$true] %s232_s12 }
  0x11   : > { %s1213_s14 = sadd.s32 1, %s1107_s29   ;;  %s60_s15 = sadd.s32 1, %s1103_s28 }
  0x12   : > { %s1398_s10 = scalar_select %p1199_p8, 1, 0 }
  0x13   : > { %p932_p9 = pneg %p1199_p8  ;;  %s57_s16 = ssub.s32 %s1107_s29, %s1213_s14 }
  0x14   : > { %s996_s17 = scalar_lea.vmem %s233_s12, 256  ;;  %p1004_p5 = scmp.lt.s32.totalorder %s233_s12, %s233_s12 }
  0x15   : > { %p1208_p11 = pnand %p932_p9, %p1390_p1  ;;  %p997_p13 = scmp.ne.s32.totalorder %s233_s12, %s996_s17 }
  0x16   : > { %p1005_p7 = scmp.lt.s32.totalorder %s996_s17, %s996_s17 }
  0x17   : > { %p987_p12 = pneg %p1208_p11 }
  0x18   : > { %p1006_p10 = por %p1005_p7, %p1004_p5 }
  0x19   : > { %p999_p0 = pnand %p997_p13, %p987_p12 }
  0x1b   : > { %p1000_p3 = pneg %p999_p0 }
  0x1d   : > { %p1007_p2 = pnand %p1006_p10, %p1000_p3 }
  0x1f   : > { %1010 = shalt.err (!%p1007_p2)
}
  0x20   : > { %s1391_s18 = smov 128   ;;  %s1392_s19 = smov 8  }
  0x21   : > { %935 = dma.hbm_to_vmem [thread:$0]  (!%p1208_p11), %s1384_s2, 256, %s233_s12, [#allocation7], %s1391_s18, %s1391_s18, %s1392_s19  }
  0x22   : > { %p58_p2 = scmp.eq.s32.totalorder %s57_s16, 0  ;;  %p67_p9 = scmp.ne.s32.totalorder %s1103_s28, %s1099_s27 }
  0x23   : > { %p68_p10 = scmp.eq.s32.totalorder %s1107_s29, 0  ;;  %p945_p12 = scmp.lt.s32.totalorder %s1107_s29, 2 }
  0x24   : > { %s1233_s22 = scalar_select %p58_p2, %s1103_s28, %s60_s15  }
  0x25   : > { %p69_p13 = por %p68_p10, %p67_p9  ;;  %p1400_p0 = scmp.eq.s32.totalorder %s1180_s5, 1 }
  0x26   : > { %s263_s24 = sand.u32 1, %s1103_s28   ;;  %s870_s25 = sshll.u32 %s1107_s29, 8 }
  0x27   : > { %p1237_p3 = por %p1400_p0, %p67_p9  ;;  %s844_s30 = sshll.u32 %s263_s24, 4 }
  0x28   : > { %s1246_s17 = scalar_lea.hbm %s1383_s1, %s870_s25  ;;  %s267_s12 = scalar_lea.vmem [#allocation3], %s844_s30 }
  0x29   : > { %s1401_s23 = scalar_select %p1237_p3, 1, 0 }
  0x2a   : > { %s274_s15 = sshll.u32 %s267_s12, 4  ;;  %p1248_p11 = pnand %p945_p12, %p69_p13  ;;  %s1252_s15 = int_to_ptr.vmem [resolvable:$true] %s274_s15 }
  0x2b   : > { %s1254_s20 = scalar_lea.sflag [#allocation4], %s263_s24  ;;  %s1011_s21 = scalar_lea.hbm %s1246_s17, 256 }
  0x2c   : > { %p1012_p5 = scmp.ne.s32.totalorder %s1246_s17, %s1011_s21  ;;  %p1013_p7 = pneg %p1248_p11 }
  0x2d   : > { %s1016_s30 = scalar_lea.hbm %s1383_s1, 512  ;;  %p1017_p10 = scmp.lt.s32.totalorder %s1246_s17, %s1383_s1 }
  0x2e   : > { %p1014_p2 = pnand %p1013_p7, %p1012_p5  ;;  %p1018_p12 = scmp.lt.s32.totalorder %s1016_s30, %s1011_s21 }
  0x30   : > { %p1015_p9 = pneg %p1014_p2  ;;  %p1019_p13 = por %p1018_p12, %p1017_p10 }
  0x32   : > { %p1020_p0 = pnand %p1019_p13, %p1015_p9 }
  0x34   : > { %1023 = shalt.err (!%p1020_p0)
}
  0x35   : > { %s1024_s24 = scalar_lea.vmem %s1252_s15, 256  ;;  %s1112_s18 = smov [#allocation3]  }
  0x36   : > { %p1025_p1 = scmp.ne.s32.totalorder %s1252_s15, %s1024_s24  ;;  %s1029_s19 = sshll.u32 %s1112_s18, 4  ;;  %s1030_s19 = int_to_ptr.vmem [resolvable:$false] %s1029_s19 }
  0x37   : > { %s1031_s25 = scalar_lea.vmem %s1030_s19, 512  ;;  %p1032_p2 = scmp.lt.s32.totalorder %s1252_s15, %s1030_s19 }
  0x38   : > { %p1027_p6 = pnand %p1025_p1, %p1013_p7  ;;  %p1033_p3 = scmp.lt.s32.totalorder %s1031_s25, %s1024_s24 }
  0x3a   : > { %p1028_p5 = pneg %p1027_p6  ;;  %p1034_p4 = por %p1033_p3, %p1032_p2 }
  0x3c   : > { %p1035_p8 = pnand %p1034_p4, %p1028_p5 }
  0x3e   : > { %1038 = shalt.err (!%p1035_p8)
}
  0x3f   : > { %s1403_s21 = smov 8   ;;  %s1404_s11 = smov 128  }
  0x40   : > { %939 = dma.hbm_to_vmem [thread:$0]  (!%p1248_p11), %s1246_s17, 256, %s1252_s15, %s1254_s20, %s1404_s11, %s1404_s11, %s1403_s21  }
  0x41   : > { %p1405_p1 = scmp.ne.s32.totalorder %s1398_s10, 0 }
  0x42   : > { %s1281_s18 = sand.u32 (!%p1405_p1), 1, %s1099_s27   ;;  %p1406_p4 = scmp.ne.s32.totalorder (!%p1405_p1), %s1396_s8, 0 }
  0x43   : > { %286 = sbr.rel (%p1405_p1) target bundleno = 873 (0x369), region = 44  ;;  %s848_s19 = sshll.u32 (!%p1405_p1), %s1281_s18, 4 }
  0x44   : > { %s289_s30 = scalar_lea.sflag (!%p1405_p1), [#allocation4], %s1281_s18  ;;  %s292_s16 = scalar_lea.vmem (!%p1405_p1), [#allocation3], %s848_s19 }
  0x48   : > { %1082 = dma.done.wait (%p1406_p4), %s289_s30, 256  }
  0x49   : > { %1084 = vsyncadd (%p1406_p4), %s289_s30, 4294967040  ;;  %p1407_p6 = scmp.eq.s32.totalorder %s1180_s5, 0 }
  0x4b   : > { %1086 = dma.done.wait (%p1407_p6), [#allocation7], 256   ;;  %p1408_p8 = pmov %p1407_p6 }
  0x4c   : > { %vm353_vm0 = vcmask 130048   ;;  %v352_v1 = vld [vmem:[#allocation6 + $0x8] sm:$0xff]  ;;  %v351_v2 = vld [vmem:[#allocation6] sm:$0xff]  ;;  %p337_p3 = scmp.lt.s32.totalorder %s1180_s5, 1  ;;  %v531_v9 = vld [vmem:[%s1386_s4 + $0x18] sm:$0xff]  ;;  %vm525_vm1 = vcmask 261120  }
  0x4d   : > { %1088 = vsyncadd (%p1408_p8), [#allocation7], 4294967040  ;;  %v349_v3 = vld [vmem:[%s292_s16] sm:$0xff]  ;;  %892 = vmatprep.subr.mxu0 %v352_v1  ;;  %v350_v4 = vld [vmem:[%s292_s16 + $0x8] sm:$0xff]  ;;  %s699_s21 = scalar_lea.sflag [#allocation5], %s1281_s18  ;;  %p1409_p7 = scmp.ne.s32.totalorder %s1401_s23, 0 }
  0x4e   : > { %896 = vmatprep.mubr.msk.f32.mxu0 %vm353_vm0, %v349_v3  ;;  %893 = vmatpush3.msra.mxu0 %v352_v1  ;;  %s1299_s8 = scalar_select %p337_p3, %s1180_s5, 1  ;;  %v530_v10 = vld [vmem:[%s1386_s4 + $0x10] sm:$0xff]  ;;  %v529_v11 = vld [vmem:[%s1386_s4 + $0x8] sm:$0xff]  ;;  %v528_v12 = vld [vmem:[%s1386_s4] sm:$0xff] }
  0x4f   : > { %894 = vmatprep.subr.mxu0 %v351_v2  ;;  %v857_v13 = vld [vmem:[%s1385_s3] ss:$0 sm:$0xff]  ;;  %s1113_s30 = smov [#allocation8]  }
  0x50   : > { %895 = vmatpush3.msra.mxu0 %v351_v2  ;;  %s871_s10 = sshll.u32 %s1299_s8, 4  ;;  %s1043_s16 = sshll.u32 %s1113_s30, 4  ;;  %s1044_s16 = int_to_ptr.vmem [resolvable:$false] %s1043_s16 }
  0x51   : > { %897 = vmatmul.mubr.msk.f32.vlgmr.msra.gmra.mxu0 %vm353_vm0, %v350_v4  ;;  %s341_s20 = scalar_lea.vmem %s1382_s0, %s871_s10  ;;  %906 = vmatprep.subr.mxu0 %v531_v9  ;;  %s1045_s17 = scalar_lea.vmem %s1044_s16, 512 }
  0x52   : > { %v347_v5 = vld [vmem:[%s341_s20] sm:$0xff]  ;;  %v348_v8 = vld [vmem:[%s341_s20 + $0x8] sm:$0xff]  ;;  %907 = vmatpush3.msra.mxu0 %v531_v9  ;;  %s329_s20 = scalar_lea.vmem [#allocation8], %s848_s19  ;;  %s873_s19 = sshll.u32 %s1180_s5, 8 }
  0x53   : > { %903 = vmatprep.mubr.msk.f32.mxu1 %vm353_vm0, %v347_v5  ;;  %908 = vmatprep.subr.mxu0 %v530_v10  ;;  %s717_s13 = sshll.u32 %s329_s20, 4  ;;  %s1334_s25 = scalar_lea.hbm %s1388_s6, %s873_s19  ;;  %s1328_s13 = int_to_ptr.vmem [resolvable:$true] %s717_s13 }
  0x54   : > { %909 = vmatpush3.msra.mxu0 %v530_v10  ;;  %s1039_s11 = scalar_lea.vmem %s1328_s13, 256  ;;  %p1046_p12 = scmp.lt.s32.totalorder %s1328_s13, %s1044_s16 }
  0x55   : > { %910 = vmatprep.subr.mxu0 %v529_v11  ;;  %p1040_p11 = scmp.ne.s32.totalorder %s1328_s13, %s1039_s11  ;;  %p1047_p13 = scmp.lt.s32.totalorder %s1045_s17, %s1039_s11 }
  0x56   : > { %911 = vmatpush3.msra.mxu0 %v529_v11 }
  0x57   : > { %912 = vmatprep.subr.mxu0 %v528_v12  ;;  %p1041_p9 = pnand %p1040_p11, %p1409_p7  ;;  %p1048_p0 = por %p1047_p13, %p1046_p12 }
  0x58   : > { %913 = vmatpush3.msra.mxu0 %v528_v12 }
  0x59   : > { %p1042_p10 = pneg %p1041_p9 }
  0x5b   : > { %p1049_p5 = pnand %p1048_p0, %p1042_p10 }
 0x111   : > { %v898_v6 = vpop.f32.mrf.mxu0 }
 0x112   : > { %899 = vmatprep.subr.mxu1 %v898_v6 }
 0x113   : > { %v426_v7 = vpop.f32.mrf.mxu0  ;;  %900 = vmatpush3.msra.mxu1 %v898_v6 }
 0x114   : > { %901 = vmatprep.subr.mxu1 %v426_v7 }
 0x115   : > { %902 = vmatpush3.msra.mxu1 %v426_v7 }
 0x116   : > { %904 = vmatmul.mubr.msk.f32.vlgmr.msra.gmra.mxu1 %vm353_vm0, %v348_v8 }
 0x117   : > { %921 = vmatprep.mubr.msk.f32.mxu1 %vm353_vm0, %v347_v5 }
 0x1d6   : > { %v905_v14 = vpop.f32.mrf.mxu1 }
 0x1d7   : > { %v520_v15 = vadd.f32 %v905_v14, %v857_v13 }
 0x1d8   : > { %v514_v16 = vpop.f32.mrf.mxu1 }
 0x1d9   : > { %v524_v17 = vmax.f32 %v520_v15, 0.0  ;;  %v515_v18 = vadd.f32 %v857_v13, %v514_v16 }
 0x1db   : > { %v523_v19 = vmax.f32 %v515_v18, 0.0  ;;  %527 = vst.msk [vmem:[%s329_s20 + $0x8] sm:$0xff] %vm525_vm1, %v524_v17 }
 0x1dd   : > { %526 = vst.msk [vmem:[%s329_s20] sm:$0xff] %vm525_vm1, %v523_v19  ;;  %914 = vmatprep.mubr.msk.f32.mxu0 %vm525_vm1, %v523_v19 }
 0x1de   : > { %915 = vmatmul.mubr.msk.f32.vlgmr.msra.gmra.mxu0 %vm525_vm1, %v524_v17 }
 0x29e   : > { %v916_v20 = vpop.f32.mrf.mxu0 }
 0x29f   : > { %917 = vmatprep.subr.mxu1 %v916_v20 }
 0x2a0   : > { %v604_v21 = vpop.f32.mrf.mxu0  ;;  %918 = vmatpush3.msra.mxu1 %v916_v20 }
 0x2a1   : > { %919 = vmatprep.subr.mxu1 %v604_v21 }
 0x2a2   : > { %920 = vmatpush3.msra.mxu1 %v604_v21 }
 0x2a3   : > { %922 = vmatmul.mubr.msk.f32.vlgmr.msra.gmra.mxu1 %vm353_vm0, %v348_v8 }
 0x2a4   : > { %1052 = shalt.err (!%p1049_p5)
}
 0x2a5   : > { %s1053_s5 = scalar_lea.hbm %s1334_s25, 256  ;;  %s1057_s19 = scalar_lea.hbm %s1388_s6, 512 }
 0x2a6   : > { %p1054_p2 = scmp.ne.s32.totalorder %s1334_s25, %s1053_s5  ;;  %p1058_p6 = scmp.lt.s32.totalorder %s1334_s25, %s1388_s6 }
 0x2a7   : > { %p1059_p8 = scmp.lt.s32.totalorder %s1057_s19, %s1053_s5 }
 0x2a8   : > { %p1055_p1 = pnand %p1054_p2, %p1409_p7 }
 0x2a9   : > { %p1060_p3 = por %p1059_p8, %p1058_p6 }
 0x2aa   : > { %p1056_p4 = pneg %p1055_p1 }
 0x2ac   : > { %p1061_p11 = pnand %p1060_p3, %p1056_p4 }
 0x2ae   : > { %1064 = shalt.err (!%p1061_p11)
}
 0x2af   : > { %s1114_s11 = smov 128   ;;  %s1115_s30 = smov 8   ;;  %v862_v22 = vld [vmem:[#allocation2] ss:$0 sm:$0xff]  ;;  %vm695_vm2 = vcmask 7168  }
 0x2b0   : > { %930 = dma.vmem_to_hbm [thread:$0]  (%p1409_p7), %s1328_s13, 256, %s1334_s25, %s699_s21, %s1114_s11, %s1114_s11, %s1115_s30  }
 0x2b1   : > { %s346_s15 = scalar_lea.vmem %s1389_s7, %s871_s10 }
 0x363   : > { %v923_v23 = vpop.f32.mrf.mxu1 }
 0x364   : > { %v692_v24 = vadd.f32 %v923_v23, %v862_v22 }
 0x365   : > { %v686_v25 = vpop.f32.mrf.mxu1 }
 0x366   : > { %697 = vst.msk [vmem:[%s346_s15 + $0x8] sm:$0xff] %vm695_vm2, %v692_v24  ;;  %v687_v26 = vadd.f32 %v862_v22, %v686_v25 }
 0x368   : > { %696 = vst.msk [vmem:[%s346_s15] sm:$0xff] %vm695_vm2, %v687_v26 }
 0x369 PF: > { %s735_s23 = sand.u32 1, %s1095_s26   ;;  %p1410_p9 = scmp.ne.s32.totalorder %s1397_s9, 0 }
 0x36a   : > { %p1411_p7 = scmp.ge.s32.totalorder %s1107_s29, 2  ;;  %s736_s18 = scalar_lea.sflag [#allocation5], %s735_s23 }
 0x36c   : > { %p941_p10 = pnand %p1411_p7, %p1410_p9 }
 0x36e   : > { %p942_p12 = pneg %p941_p10 }
 0x370   : > { %1090 = dma.done.wait (%p942_p12), %s736_s18, 256  }
 0x371   : > { %1092 = vsyncadd (%p942_p12), %s736_s18, 4294967040  ;;  %p24_p13 = scmp.ge.s32.totalorder %s1213_s14, 4   ;;  %s1412_s26 = smov %s1099_s27 }
 0x372   : > { %s1413_s27 = smov %s1103_s28  ;;  %s1414_s28 = smov %s1233_s22 }
 0x373   : > { %s1415_s29 = smov %s1213_s14  ;;  %26 = sbr.rel (!%p24_p13) target bundleno = 9 (0x9), region = 108 }
 0x378   :  { %749 = vsyncpa [#allocation4], 1 }
 0x379   :  { %751 = vsyncpa [#allocation4 + $0x1], 1 }
 0x37a   :  { %752 = vsyncpa [#allocation7], 1 }
 0x37b   :  { %753 = vsyncpa [#allocation5], 1 }
 0x37c   :  { %755 = vsyncpa [#allocation5 + $0x1], 1 }

</bundles_post_ra>
